<compile_context>
chip_gen: v6e
topology: v6e:2x2x1
jax: 0.10.0
libtpu: 0.0.40
codegen_flags: <defaults>
</compile_context>

<pallas_src>
import functools
import math
from typing import NamedTuple

import numpy as np
import jax
import jax.numpy as jnp
from jax import lax
from jax.experimental import pallas as pl
from jax.experimental.pallas import tpu as pltpu


def _round_up(a, m):
    return ((a + m - 1) // m) * m


# ----------------------------------- kernel -------------------------------------------
def _ple_kernel(x_ref, edges_ref, invw_ref, w_ref, b_ref, o_ref, *, n_bins, activation):
    # x_ref:     (1, TF, TB)       local features on sublanes, batch on the 128-lane axis
    # edges_ref: (1, K, TF, 1)     left bin edges
    # invw_ref:  (1, K, TF, 1)     1 / bin width (precomputed: multiply, not divide)
    # w_ref:     (1, K*TF, TF*D)   block-diagonal weight for this feature block
    # b_ref:     (1, 1, TF*D)      per-feature bias, flattened
    # o_ref:     (TB, TF*D)        lane-dense slab of the (B, F*D) output
    x_t = x_ref[0]                                        # (TF, TB) float32

    # Piecewise-linear encoding: one (TF, TB) VPU tile per bin, statically unrolled.
    # First bin: clamp_max(1); last bin: clamp_min(0); middle bins: clamp(0, 1).
    pieces = []
    for k in range(n_bins):
        t_k = (x_t - edges_ref[0, k]) * invw_ref[0, k]    # (TF, TB)
        if k < n_bins - 1:
            t_k = jnp.minimum(t_k, 1.0)
        if k > 0:
            t_k = jnp.maximum(t_k, 0.0)
        pieces.append(t_k)
    enc = jnp.concatenate(pieces, axis=0)                 # (K*TF, TB), row = k*TF + f

    # Single MXU matmul per step, contracting jointly over (bin, local feature).
    out = lax.dot_general(
        enc, w_ref[0],
        dimension_numbers=(((0,), (0,)), ((), ())),       # transposed-LHS ("TN")
        preferred_element_type=jnp.float32,
    )                                                     # (TB, TF*D), f32 accumulation
    out = out + b_ref[0]
    if activation:
        out = jnp.maximum(out, 0.0)
    o_ref[...] = out.astype(o_ref.dtype)


# ------------------------------ parameter preparation ---------------------------------
class PLEParams(NamedTuple):
    edges_r: jax.Array     # (n_f_blocks, K, TF, 1)
    invw_r: jax.Array      # (n_f_blocks, K, TF, 1)
    w_bd: jax.Array        # (n_f_blocks, K*TF, TF*D_pad)  block-diagonal weight
    bias_r: jax.Array      # (n_f_blocks, 1, TF*D_pad)
    n_features: int
    n_bins: int
    d_embedding: int
    d_pad: int
    tile_f: int
    f_pad: int
    activation: bool


def _choose_tf_and_dpad(D, K, F, batch_hint):
    # Base TF: smallest multiple of 8 making TF*D a multiple of 128 (lane-dense output).
    tf = max(8, 128 // math.gcd(128, D))
    d_pad = D
    if tf > 16:
        # Awkward D (e.g. 10, 24+2, ...): pad D to a multiple of 16 so TF stays 8 instead
        # of inflating the block-diagonal weight / MXU work by up to 16x.
        d_pad = _round_up(D, 16)
        tf = 8
    if batch_hint is not None and batch_hint <= 128:
        # Small-batch regime: widen the per-step output slab (wider lane-dense stores,
        # fewer grid steps).  Keep >= 2 feature blocks (v7x has 2 TensorCores) and keep
        # the double-buffered block-diagonal weight under ~4 MiB of VMEM.
        while tf < 64:
            nt = tf * 2
            if nt > _round_up(F, 8):
                break
            if _round_up(F, nt) // nt < 2:
                break
            if 2 * K * nt * nt * d_pad * 4 > (4 << 20):
                break
            tf = nt
    return tf, d_pad


def prepare_rtdl_num_embeddings(edges, width, weight, bias, *, activation=True,
                                batch_hint=None):
    """Hoisted, x-independent prep (do once at parameter-load time, not per forward).

    edges, width: (F, n_bins) left bin edges / bin widths (widths must be > 0)
    weight:       (F, n_bins, D)
    bias:         (F, D)
    """
    edges = jnp.asarray(edges, jnp.float32)
    width = jnp.asarray(width, jnp.float32)
    weight = jnp.asarray(weight, jnp.float32)
    bias = jnp.asarray(bias, jnp.float32)

    F, K = edges.shape
    D = weight.shape[-1]
    assert K >= 2, "PiecewiseLinearEmbeddings requires n_bins >= 2 (>= 3 bin edges)"

    TF, D_pad = _choose_tf_and_dpad(D, K, F, batch_hint)
    F_pad = _round_up(F, TF)
    n_f = F_pad // TF
    pf, pd = F_pad - F, D_pad - D

    inv_width = 1.0 / width                            # divide once; kernel multiplies
    edges_p = jnp.pad(edges, ((0, pf), (0, 0)))
    invw_p = jnp.pad(inv_width, ((0, pf), (0, 0)))     # padded features -> enc == 0
    w_p = jnp.pad(weight, ((0, pf), (0, 0), (0, pd)))
    b_p = jnp.pad(bias, ((0, pf), (0, pd)))

    # Per-bin (TF, 1) columns, indexable along leading dims in the kernel.
    edges_r = edges_p.reshape(n_f, TF, K).transpose(0, 2, 1)[..., None]
    invw_r = invw_p.reshape(n_f, TF, K).transpose(0, 2, 1)[..., None]

    # Block-diagonal weight: W_bd[n, k*TF + f, f*D_pad + d] = W[n*TF + f, k, d].
    eye = jnp.eye(TF, dtype=jnp.float32)
    w_bd = jnp.einsum(
        "nfkd,fg->nkfgd", w_p.reshape(n_f, TF, K, D_pad), eye
    ).reshape(n_f, K * TF, TF * D_pad)
    bias_r = b_p.reshape(n_f, 1, TF * D_pad)

    return PLEParams(edges_r, invw_r, w_bd, bias_r,
                     n_features=F, n_bins=K, d_embedding=D, d_pad=D_pad,
                     tile_f=TF, f_pad=F_pad, activation=activation)


# ------------------------------------ forward -----------------------------------------
def _pick_batch_tile(B, TF, D_pad):
    if B <= 128:
        TB = _round_up(B, 16)            # single batch block; 16 keeps bf16 stores aligned
        return TB, TB
    slab_cap = 4 << 20                   # target ~2-4 MiB output slab per buffer
    tb_cap = max(128, ((slab_cap // (TF * D_pad * 4)) // 128) * 128)
    candidates = [c for c in (2048, 1024, 512, 256, 128) if c <= tb_cap] or [128]
    # Minimize batch-padding write amplification; tie-break toward the larger tile.
    TB = min(candidates, key=lambda c: (_round_up(B, c) - B, -c))
    return TB, _round_up(B, TB)


def _vmem_estimate_bytes(TB, TF, D_pad, K, out_itemsize):
    out_b = 2 * TB * TF * D_pad * out_itemsize           # double-buffered output slab
    x_b = 2 * TF * max(TB, 128) * 4
    w_b = 2 * K * TF * TF * D_pad * 4                     # block-diagonal weight
    ew_b = 2 * 2 * K * TF * 128 * 4                       # edges + 1/width (lane-padded)
    b_b = 2 * 8 * TF * D_pad * 4
    return out_b + x_b + w_b + ew_b + b_b


def rtdl_num_embeddings_forward(x, params: PLEParams, *, out_dtype=None):
    """x: (B, F) -> (B, F, D) piecewise-linear embeddings (+ optional ReLU)."""
    in_dtype = x.dtype if jnp.issubdtype(x.dtype, jnp.floating) else jnp.float32
    x = x.astype(jnp.float32)
    B, F = x.shape
    assert F == params.n_features

    K, D, D_pad = params.n_bins, params.d_embedding, params.d_pad
    TF, F_pad = params.tile_f, params.f_pad
    n_f = F_pad // TF
    out_dtype = np.dtype(out_dtype if out_dtype is not None else in_dtype)

    TB, B_pad = _pick_batch_tile(B, TF, D_pad)
    n_b = B_pad // TB

    # x -> (feature_blocks, TF, B_pad): batch on the lane axis (pad+transpose fuse under jit).
    x_r = jnp.pad(x, ((0, B_pad - B), (0, F_pad - F))).T.reshape(n_f, TF, B_pad)

    vmem_limit = int(min(
        max(1.5 * _vmem_estimate_bytes(TB, TF, D_pad, K, out_dtype.itemsize) + (4 << 20),
            32 << 20),
        56 << 20))                        # stay under v7x's 64 MiB physical VMEM

    kernel = functools.partial(_ple_kernel, n_bins=K, activation=params.activation)
    out = pl.pallas_call(
        kernel,
        out_shape=jax.ShapeDtypeStruct((B_pad, F_pad * D_pad), out_dtype),
        grid=(n_f, n_b),                  # feature blocks OUTER: constants stay resident
        in_specs=[
            pl.BlockSpec((1, TF, TB), lambda fi, bi: (fi, 0, bi)),
            pl.BlockSpec((1, K, TF, 1), lambda fi, bi: (fi, 0, 0, 0)),
            pl.BlockSpec((1, K, TF, 1), lambda fi, bi: (fi, 0, 0, 0)),
            pl.BlockSpec((1, K * TF, TF * D_pad), lambda fi, bi: (fi, 0, 0)),
            pl.BlockSpec((1, 1, TF * D_pad), lambda fi, bi: (fi, 0, 0)),
        ],
        out_specs=pl.BlockSpec((TB, TF * D_pad), lambda fi, bi: (bi, fi)),
        compiler_params=pltpu.CompilerParams(
            dimension_semantics=("parallel", "parallel"),
            vmem_limit_bytes=vmem_limit,
        ),
    )(x_r, params.edges_r, params.invw_r, params.w_bd, params.bias_r)

    # (B_pad, F_pad*D_pad) -> (B, F, D); the reshape is contiguous, slices drop padding.
    return out.reshape(B_pad, F_pad, D_pad)[:B, :F, :D]


def rtdl_num_embeddings_apply(x, edges, width, weight, bias, *, activation=True,
                              out_dtype=None):
    """One-shot convenience wrapper (prepare + forward). Prefer preparing once."""
    params = prepare_rtdl_num_embeddings(edges, width, weight, bias,
                                         activation=activation, batch_hint=x.shape[0])
    return rtdl_num_embeddings_forward(x, params, out_dtype=out_dtype)


# ----------------------------------- reference -----------------------------------------
def _reference(x, edges, width, weight, bias, activation=True):
    t = (x[..., None] - edges[None]) / width[None]             # (B, F, n_bins)
    enc = jnp.concatenate(
        [jnp.minimum(t[..., :1], 1.0),
         jnp.clip(t[..., 1:-1], 0.0, 1.0),
         jnp.maximum(t[..., -1:], 0.0)],
        axis=-1,
    )
    out = jnp.einsum("bfk,fkd->bfd", enc, weight) + bias[None]
    if activation:
        out = jnp.maximum(out, 0.0)
    return out


if __name__ == "__main__":
    key = jax.random.PRNGKey(0)
    k_x, k_w, k_b, k_x2 = jax.random.split(key, 4)

    B, F, N_BINS, D = 16, 12, 8, 32
    ACTIVATION = True

    # Deterministic, strictly increasing bin edges per feature (like the `bins` ctor arg).
    full_edges = jnp.stack(
        [jnp.linspace(-2.0 + 0.1 * f, 2.0 + 0.2 * f, N_BINS + 1) for f in range(F)]
    ).astype(jnp.float32)                                        # (F, n_bins + 1)
    edges = full_edges[:, :-1]                                   # left edges  (F, n_bins)
    width = jnp.diff(full_edges, axis=1)                         # bin widths  (F, n_bins)

    # _NLinear init: uniform(-1/sqrt(n_bins), 1/sqrt(n_bins)) for weight and bias.
    bound = 1.0 / math.sqrt(N_BINS)
    weight = jax.random.uniform(k_w, (F, N_BINS, D), jnp.float32, -bound, bound)
    bias = jax.random.uniform(k_b, (F, D), jnp.float32, -bound, bound)

    # ---- small-batch path (f32 output) -------------------------------------------------
    x = jax.random.normal(k_x, (B, F), jnp.float32)
    params = prepare_rtdl_num_embeddings(edges, width, weight, bias,
                                         activation=ACTIVATION, batch_hint=B)
    fwd = jax.jit(lambda xx: rtdl_num_embeddings_forward(xx, params))
    out = jax.block_until_ready(fwd(x))
    ref = _reference(x, edges, width, weight, bias, ACTIVATION)
    assert out.shape == (B, F, D)
    assert jnp.allclose(out, ref, atol=1e-4, rtol=1e-4), "f32 mismatch vs reference"

    # ---- larger-batch path (multi batch-block pipeline) + bf16 output path -------------
    B2 = 300
    x2 = jax.random.normal(k_x2, (B2, F), jnp.float32)
    params2 = prepare_rtdl_num_embeddings(edges, width, weight, bias,
                                          activation=ACTIVATION, batch_hint=B2)
    fwd2 = jax.jit(lambda xx: rtdl_num_embeddings_forward(xx, params2,
                                                          out_dtype=jnp.bfloat16))
    out2 = jax.block_until_ready(fwd2(x2))
    ref2 = _reference(x2, edges, width, weight, bias, ACTIVATION)
    assert out2.shape == (B2, F, D) and out2.dtype == jnp.bfloat16
    assert jnp.allclose(out2.astype(jnp.float32), ref2, atol=3e-2, rtol=3e-2), \
        "bf16 mismatch vs reference"

    print("KERNEL_OK")
</pallas_src>

<mosaic_0001>
module attributes {stable_mosaic.version = 11 : i64} {
  func.func @_ple_kernel(%arg0: i32, %arg1: i32, %arg2: memref<1x8x16xf32, #tpu.memory_space<vmem>>, %arg3: memref<1x8x8x1xf32, #tpu.memory_space<vmem>>, %arg4: memref<1x8x8x1xf32, #tpu.memory_space<vmem>>, %arg5: memref<1x64x256xf32, #tpu.memory_space<vmem>>, %arg6: memref<1x1x256xf32, #tpu.memory_space<vmem>>, %arg7: memref<16x256xf32, #tpu.memory_space<vmem>>) attributes {dimension_semantics = [#tpu.dimension_semantics<parallel>, #tpu.dimension_semantics<parallel>], iteration_bounds = array<i64: 2, 1>, scalar_prefetch = 0 : i64, scratch_operands = 0 : i64, tpu.core_type = #tpu.core_type<tc>, window_params = [{transform_indices = @transform_0, window_bounds = array<i64: 1, 8, 16>}, {transform_indices = @transform_1, window_bounds = array<i64: 1, 8, 8, 1>}, {transform_indices = @transform_2, window_bounds = array<i64: 1, 8, 8, 1>}, {transform_indices = @transform_3, window_bounds = array<i64: 1, 64, 256>}, {transform_indices = @transform_4, window_bounds = array<i64: 1, 1, 256>}, {transform_indices = @transform_5, window_bounds = array<i64: 16, 256>}]} {
    %c0 = arith.constant 0 : index
    %c0_0 = arith.constant 0 : index
    %c0_1 = arith.constant 0 : index
    %0 = vector.load %arg2[%c0, %c0_0, %c0_1] : memref<1x8x16xf32, #tpu.memory_space<vmem>>, vector<1x8x16xf32>
    %1 = vector.shape_cast %0 : vector<1x8x16xf32> to vector<8x16xf32>
    %c0_2 = arith.constant 0 : index
    %c0_3 = arith.constant 0 : index
    %c0_4 = arith.constant 0 : index
    %c0_5 = arith.constant 0 : index
    %2 = vector.load %arg3[%c0_2, %c0_3, %c0_4, %c0_5] : memref<1x8x8x1xf32, #tpu.memory_space<vmem>>, vector<1x1x8x1xf32>
    %3 = vector.shape_cast %2 : vector<1x1x8x1xf32> to vector<8x1xf32>
    %4 = vector.broadcast %3 : vector<8x1xf32> to vector<8x16xf32>
    %5 = arith.subf %1, %4 : vector<8x16xf32>
    %c0_6 = arith.constant 0 : index
    %c0_7 = arith.constant 0 : index
    %c0_8 = arith.constant 0 : index
    %c0_9 = arith.constant 0 : index
    %6 = vector.load %arg4[%c0_6, %c0_7, %c0_8, %c0_9] : memref<1x8x8x1xf32, #tpu.memory_space<vmem>>, vector<1x1x8x1xf32>
    %7 = vector.shape_cast %6 : vector<1x1x8x1xf32> to vector<8x1xf32>
    %8 = vector.broadcast %7 : vector<8x1xf32> to vector<8x16xf32>
    %9 = arith.mulf %5, %8 : vector<8x16xf32>
    %cst = arith.constant 1.000000e+00 : f32
    %10 = vector.broadcast %cst : f32 to vector<8x16xf32>
    %11 = arith.minimumf %9, %10 : vector<8x16xf32>
    %c0_10 = arith.constant 0 : index
    %c1 = arith.constant 1 : index
    %c0_11 = arith.constant 0 : index
    %c0_12 = arith.constant 0 : index
    %12 = vector.load %arg3[%c0_10, %c1, %c0_11, %c0_12] : memref<1x8x8x1xf32, #tpu.memory_space<vmem>>, vector<1x1x8x1xf32>
    %13 = vector.shape_cast %12 : vector<1x1x8x1xf32> to vector<8x1xf32>
    %14 = vector.broadcast %13 : vector<8x1xf32> to vector<8x16xf32>
    %15 = arith.subf %1, %14 : vector<8x16xf32>
    %c0_13 = arith.constant 0 : index
    %c1_14 = arith.constant 1 : index
    %c0_15 = arith.constant 0 : index
    %c0_16 = arith.constant 0 : index
    %16 = vector.load %arg4[%c0_13, %c1_14, %c0_15, %c0_16] : memref<1x8x8x1xf32, #tpu.memory_space<vmem>>, vector<1x1x8x1xf32>
    %17 = vector.shape_cast %16 : vector<1x1x8x1xf32> to vector<8x1xf32>
    %18 = vector.broadcast %17 : vector<8x1xf32> to vector<8x16xf32>
    %19 = arith.mulf %15, %18 : vector<8x16xf32>
    %cst_17 = arith.constant 1.000000e+00 : f32
    %20 = vector.broadcast %cst_17 : f32 to vector<8x16xf32>
    %21 = arith.minimumf %19, %20 : vector<8x16xf32>
    %cst_18 = arith.constant 0.000000e+00 : f32
    %22 = vector.broadcast %cst_18 : f32 to vector<8x16xf32>
    %23 = arith.maximumf %21, %22 : vector<8x16xf32>
    %c0_19 = arith.constant 0 : index
    %c2 = arith.constant 2 : index
    %c0_20 = arith.constant 0 : index
    %c0_21 = arith.constant 0 : index
    %24 = vector.load %arg3[%c0_19, %c2, %c0_20, %c0_21] : memref<1x8x8x1xf32, #tpu.memory_space<vmem>>, vector<1x1x8x1xf32>
    %25 = vector.shape_cast %24 : vector<1x1x8x1xf32> to vector<8x1xf32>
    %26 = vector.broadcast %25 : vector<8x1xf32> to vector<8x16xf32>
    %27 = arith.subf %1, %26 : vector<8x16xf32>
    %c0_22 = arith.constant 0 : index
    %c2_23 = arith.constant 2 : index
    %c0_24 = arith.constant 0 : index
    %c0_25 = arith.constant 0 : index
    %28 = vector.load %arg4[%c0_22, %c2_23, %c0_24, %c0_25] : memref<1x8x8x1xf32, #tpu.memory_space<vmem>>, vector<1x1x8x1xf32>
    %29 = vector.shape_cast %28 : vector<1x1x8x1xf32> to vector<8x1xf32>
    %30 = vector.broadcast %29 : vector<8x1xf32> to vector<8x16xf32>
    %31 = arith.mulf %27, %30 : vector<8x16xf32>
    %cst_26 = arith.constant 1.000000e+00 : f32
    %32 = vector.broadcast %cst_26 : f32 to vector<8x16xf32>
    %33 = arith.minimumf %31, %32 : vector<8x16xf32>
    %cst_27 = arith.constant 0.000000e+00 : f32
    %34 = vector.broadcast %cst_27 : f32 to vector<8x16xf32>
    %35 = arith.maximumf %33, %34 : vector<8x16xf32>
    %c0_28 = arith.constant 0 : index
    %c3 = arith.constant 3 : index
    %c0_29 = arith.constant 0 : index
    %c0_30 = arith.constant 0 : index
    %36 = vector.load %arg3[%c0_28, %c3, %c0_29, %c0_30] : memref<1x8x8x1xf32, #tpu.memory_space<vmem>>, vector<1x1x8x1xf32>
    %37 = vector.shape_cast %36 : vector<1x1x8x1xf32> to vector<8x1xf32>
    %38 = vector.broadcast %37 : vector<8x1xf32> to vector<8x16xf32>
    %39 = arith.subf %1, %38 : vector<8x16xf32>
    %c0_31 = arith.constant 0 : index
    %c3_32 = arith.constant 3 : index
    %c0_33 = arith.constant 0 : index
    %c0_34 = arith.constant 0 : index
    %40 = vector.load %arg4[%c0_31, %c3_32, %c0_33, %c0_34] : memref<1x8x8x1xf32, #tpu.memory_space<vmem>>, vector<1x1x8x1xf32>
    %41 = vector.shape_cast %40 : vector<1x1x8x1xf32> to vector<8x1xf32>
    %42 = vector.broadcast %41 : vector<8x1xf32> to vector<8x16xf32>
    %43 = arith.mulf %39, %42 : vector<8x16xf32>
    %cst_35 = arith.constant 1.000000e+00 : f32
    %44 = vector.broadcast %cst_35 : f32 to vector<8x16xf32>
    %45 = arith.minimumf %43, %44 : vector<8x16xf32>
    %cst_36 = arith.constant 0.000000e+00 : f32
    %46 = vector.broadcast %cst_36 : f32 to vector<8x16xf32>
    %47 = arith.maximumf %45, %46 : vector<8x16xf32>
    %c0_37 = arith.constant 0 : index
    %c4 = arith.constant 4 : index
    %c0_38 = arith.constant 0 : index
    %c0_39 = arith.constant 0 : index
    %48 = vector.load %arg3[%c0_37, %c4, %c0_38, %c0_39] : memref<1x8x8x1xf32, #tpu.memory_space<vmem>>, vector<1x1x8x1xf32>
    %49 = vector.shape_cast %48 : vector<1x1x8x1xf32> to vector<8x1xf32>
    %50 = vector.broadcast %49 : vector<8x1xf32> to vector<8x16xf32>
    %51 = arith.subf %1, %50 : vector<8x16xf32>
    %c0_40 = arith.constant 0 : index
    %c4_41 = arith.constant 4 : index
    %c0_42 = arith.constant 0 : index
    %c0_43 = arith.constant 0 : index
    %52 = vector.load %arg4[%c0_40, %c4_41, %c0_42, %c0_43] : memref<1x8x8x1xf32, #tpu.memory_space<vmem>>, vector<1x1x8x1xf32>
    %53 = vector.shape_cast %52 : vector<1x1x8x1xf32> to vector<8x1xf32>
    %54 = vector.broadcast %53 : vector<8x1xf32> to vector<8x16xf32>
    %55 = arith.mulf %51, %54 : vector<8x16xf32>
    %cst_44 = arith.constant 1.000000e+00 : f32
    %56 = vector.broadcast %cst_44 : f32 to vector<8x16xf32>
    %57 = arith.minimumf %55, %56 : vector<8x16xf32>
    %cst_45 = arith.constant 0.000000e+00 : f32
    %58 = vector.broadcast %cst_45 : f32 to vector<8x16xf32>
    %59 = arith.maximumf %57, %58 : vector<8x16xf32>
    %c0_46 = arith.constant 0 : index
    %c5 = arith.constant 5 : index
    %c0_47 = arith.constant 0 : index
    %c0_48 = arith.constant 0 : index
    %60 = vector.load %arg3[%c0_46, %c5, %c0_47, %c0_48] : memref<1x8x8x1xf32, #tpu.memory_space<vmem>>, vector<1x1x8x1xf32>
    %61 = vector.shape_cast %60 : vector<1x1x8x1xf32> to vector<8x1xf32>
    %62 = vector.broadcast %61 : vector<8x1xf32> to vector<8x16xf32>
    %63 = arith.subf %1, %62 : vector<8x16xf32>
    %c0_49 = arith.constant 0 : index
    %c5_50 = arith.constant 5 : index
    %c0_51 = arith.constant 0 : index
    %c0_52 = arith.constant 0 : index
    %64 = vector.load %arg4[%c0_49, %c5_50, %c0_51, %c0_52] : memref<1x8x8x1xf32, #tpu.memory_space<vmem>>, vector<1x1x8x1xf32>
    %65 = vector.shape_cast %64 : vector<1x1x8x1xf32> to vector<8x1xf32>
    %66 = vector.broadcast %65 : vector<8x1xf32> to vector<8x16xf32>
    %67 = arith.mulf %63, %66 : vector<8x16xf32>
    %cst_53 = arith.constant 1.000000e+00 : f32
    %68 = vector.broadcast %cst_53 : f32 to vector<8x16xf32>
    %69 = arith.minimumf %67, %68 : vector<8x16xf32>
    %cst_54 = arith.constant 0.000000e+00 : f32
    %70 = vector.broadcast %cst_54 : f32 to vector<8x16xf32>
    %71 = arith.maximumf %69, %70 : vector<8x16xf32>
    %c0_55 = arith.constant 0 : index
    %c6 = arith.constant 6 : index
    %c0_56 = arith.constant 0 : index
    %c0_57 = arith.constant 0 : index
    %72 = vector.load %arg3[%c0_55, %c6, %c0_56, %c0_57] : memref<1x8x8x1xf32, #tpu.memory_space<vmem>>, vector<1x1x8x1xf32>
    %73 = vector.shape_cast %72 : vector<1x1x8x1xf32> to vector<8x1xf32>
    %74 = vector.broadcast %73 : vector<8x1xf32> to vector<8x16xf32>
    %75 = arith.subf %1, %74 : vector<8x16xf32>
    %c0_58 = arith.constant 0 : index
    %c6_59 = arith.constant 6 : index
    %c0_60 = arith.constant 0 : index
    %c0_61 = arith.constant 0 : index
    %76 = vector.load %arg4[%c0_58, %c6_59, %c0_60, %c0_61] : memref<1x8x8x1xf32, #tpu.memory_space<vmem>>, vector<1x1x8x1xf32>
    %77 = vector.shape_cast %76 : vector<1x1x8x1xf32> to vector<8x1xf32>
    %78 = vector.broadcast %77 : vector<8x1xf32> to vector<8x16xf32>
    %79 = arith.mulf %75, %78 : vector<8x16xf32>
    %cst_62 = arith.constant 1.000000e+00 : f32
    %80 = vector.broadcast %cst_62 : f32 to vector<8x16xf32>
    %81 = arith.minimumf %79, %80 : vector<8x16xf32>
    %cst_63 = arith.constant 0.000000e+00 : f32
    %82 = vector.broadcast %cst_63 : f32 to vector<8x16xf32>
    %83 = arith.maximumf %81, %82 : vector<8x16xf32>
    %c0_64 = arith.constant 0 : index
    %c7 = arith.constant 7 : index
    %c0_65 = arith.constant 0 : index
    %c0_66 = arith.constant 0 : index
    %84 = vector.load %arg3[%c0_64, %c7, %c0_65, %c0_66] : memref<1x8x8x1xf32, #tpu.memory_space<vmem>>, vector<1x1x8x1xf32>
    %85 = vector.shape_cast %84 : vector<1x1x8x1xf32> to vector<8x1xf32>
    %86 = vector.broadcast %85 : vector<8x1xf32> to vector<8x16xf32>
    %87 = arith.subf %1, %86 : vector<8x16xf32>
    %c0_67 = arith.constant 0 : index
    %c7_68 = arith.constant 7 : index
    %c0_69 = arith.constant 0 : index
    %c0_70 = arith.constant 0 : index
    %88 = vector.load %arg4[%c0_67, %c7_68, %c0_69, %c0_70] : memref<1x8x8x1xf32, #tpu.memory_space<vmem>>, vector<1x1x8x1xf32>
    %89 = vector.shape_cast %88 : vector<1x1x8x1xf32> to vector<8x1xf32>
    %90 = vector.broadcast %89 : vector<8x1xf32> to vector<8x16xf32>
    %91 = arith.mulf %87, %90 : vector<8x16xf32>
    %cst_71 = arith.constant 0.000000e+00 : f32
    %92 = vector.broadcast %cst_71 : f32 to vector<8x16xf32>
    %93 = arith.maximumf %91, %92 : vector<8x16xf32>
    %94 = tpu.concatenate %11, %23, %35, %47, %59, %71, %83, %93 in 0 : vector<8x16xf32>, vector<8x16xf32>, vector<8x16xf32>, vector<8x16xf32>, vector<8x16xf32>, vector<8x16xf32>, vector<8x16xf32>, vector<8x16xf32> -> vector<64x16xf32>
    %c0_72 = arith.constant 0 : index
    %c0_73 = arith.constant 0 : index
    %c0_74 = arith.constant 0 : index
    %95 = vector.load %arg5[%c0_72, %c0_73, %c0_74] : memref<1x64x256xf32, #tpu.memory_space<vmem>>, vector<1x64x256xf32>
    %96 = vector.shape_cast %95 : vector<1x64x256xf32> to vector<64x256xf32>
    %cst_75 = arith.constant dense<0.000000e+00> : vector<16x256xf32>
    %97 = tpu.matmul %94, %96, %cst_75 {dimension_numbers = #tpu.dot_dimension_numbers<[0], [0], [1], [1], [0, 1, 1, 1], [], []>} : vector<64x16xf32>, vector<64x256xf32>, vector<16x256xf32> -> vector<16x256xf32>
    %c0_76 = arith.constant 0 : index
    %c0_77 = arith.constant 0 : index
    %c0_78 = arith.constant 0 : index
    %98 = vector.load %arg6[%c0_76, %c0_77, %c0_78] : memref<1x1x256xf32, #tpu.memory_space<vmem>>, vector<1x1x256xf32>
    %99 = vector.shape_cast %98 : vector<1x1x256xf32> to vector<1x256xf32>
    %100 = vector.broadcast %99 : vector<1x256xf32> to vector<16x256xf32>
    %101 = arith.addf %97, %100 : vector<16x256xf32>
    %cst_79 = arith.constant 0.000000e+00 : f32
    %102 = vector.broadcast %cst_79 : f32 to vector<16x256xf32>
    %103 = arith.maximumf %101, %102 : vector<16x256xf32>
    %c0_80 = arith.constant 0 : index
    %c0_81 = arith.constant 0 : index
    %104 = vector.load %arg7[%c0_80, %c0_81] : memref<16x256xf32, #tpu.memory_space<vmem>>, vector<16x256xf32>
    tpu.vector_store %arg7[%c0_80, %c0_81], %103 {strides = array<i32>} : memref<16x256xf32, #tpu.memory_space<vmem>>, vector<16x256xf32>,
    return
  }
  func.func @transform_0(%arg0: i32, %arg1: i32) -> (i32, i32, i32) {
    %c0_i32 = arith.constant 0 : i32
    %c0_i32_0 = arith.constant 0 : i32
    return %arg0, %c0_i32, %arg1 : i32, i32, i32
  }
  func.func @transform_1(%arg0: i32, %arg1: i32) -> (i32, i32, i32, i32) {
    %c0_i32 = arith.constant 0 : i32
    %c0_i32_0 = arith.constant 0 : i32
    %c0_i32_1 = arith.constant 0 : i32
    %c0_i32_2 = arith.constant 0 : i32
    return %arg0, %c0_i32, %c0_i32_0, %c0_i32_1 : i32, i32, i32, i32
  }
  func.func @transform_2(%arg0: i32, %arg1: i32) -> (i32, i32, i32, i32) {
    %c0_i32 = arith.constant 0 : i32
    %c0_i32_0 = arith.constant 0 : i32
    %c0_i32_1 = arith.constant 0 : i32
    %c0_i32_2 = arith.constant 0 : i32
    return %arg0, %c0_i32, %c0_i32_0, %c0_i32_1 : i32, i32, i32, i32
  }
  func.func @transform_3(%arg0: i32, %arg1: i32) -> (i32, i32, i32) {
    %c0_i32 = arith.constant 0 : i32
    %c0_i32_0 = arith.constant 0 : i32
    %c0_i32_1 = arith.constant 0 : i32
    return %arg0, %c0_i32, %c0_i32_0 : i32, i32, i32
  }
  func.func @transform_4(%arg0: i32, %arg1: i32) -> (i32, i32, i32) {
    %c0_i32 = arith.constant 0 : i32
    %c0_i32_0 = arith.constant 0 : i32
    %c0_i32_1 = arith.constant 0 : i32
    return %arg0, %c0_i32, %c0_i32_0 : i32, i32, i32
  }
  func.func @transform_5(%arg0: i32, %arg1: i32) -> (i32, i32) {
    %c0_i32 = arith.constant 0 : i32
    return %arg1, %arg0 : i32, i32
  }
}

</mosaic_0001>

<bundles_post_ra>
// kernel: _lambda_.1
= control target key start
LH: loop header
LB: loop body
LE: loop exit
PB: predicated region body
PF: predicated region fallthrough
CT: control target
= control target key end

     0   :  { %s1374_s0 = inlined_call_operand.vmem [shape: f32[2,8,16], index: 0, kind: input, shape index: {}]   ;;  %s1375_s1 = inlined_call_operand.hbm [shape: f32[2,8,8,1], index: 1, kind: input, shape index: {}]   ;;  %s1376_s2 = inlined_call_operand.hbm [shape: f32[2,8,8,1], index: 2, kind: input, shape index: {}]   ;;  %s1377_s3 = inlined_call_operand.hbm [shape: f32[2,64,256], index: 3, kind: input, shape index: {}]   ;;  %s1378_s4 = inlined_call_operand.vmem [shape: f32[2,1,256], index: 4, kind: input, shape index: {}]   ;;  %s1379_s5 = inlined_call_operand.vmem [shape: f32[16,512], index: 5, kind: output, shape index: {}]  }
   0x1   :  { %1382 = sst [smem:[#allocation13_spill]] %s1376_s2 }
   0x2   :  { %10 = vsyncpa [#allocation3], 0 }
   0x3   :  { %12 = vsyncpa [#allocation3 + $0x1], 0 }
   0x4   :  { %13 = vsyncpa [#allocation5], 0 }
   0x5   :  { %15 = vsyncpa [#allocation5 + $0x1], 0  ;;  %s1162_s18 = smov 0   ;;  %s1164_s19 = smov 0  }
   0x6   :  { %s1166_s20 = smov 0   ;;  %s1168_s21 = smov 0  }
   0x7   :  { %s1170_s22 = smov 0   ;;  %s1172_s23 = smov 0  }
   0x8 LB: > { %1383 = sst [smem:[#allocation10_spill]] %s1109_s20  ;;  %s1191_s24 = sadd.s32 4294967295, %s1121_s23   ;;  %s1121_s23 = sphi %s1172_s23, %s21_s23   ;;  %s1117_s22 = sphi %s1170_s22, %s1398_s22   ;;  %s1113_s21 = sphi %s1168_s21, %s1397_s21   ;;  %s1109_s20 = sphi %s1166_s20, %s1393_s20   ;;  %s1105_s19 = sphi %s1164_s19, %s1396_s19   ;;  %s1101_s18 = sphi %s1162_s18, %s1395_s18  }
   0x9   : > { %s33_s25 = sadd.s32 1, %s1117_s22  ;;  %s68_s26 = sadd.s32 1, %s1109_s20 }
   0xa   : > { %p35_p0 = scmp.ge.s32.totalorder %s33_s25, 2  ;;  %p75_p1 = scmp.ne.s32.totalorder %s1109_s20, %s1105_s19 }
   0xb   : > { %p76_p2 = scmp.eq.s32.totalorder %s1121_s23, 0  ;;  %p81_p4 = scmp.ne.s32.totalorder %s1105_s19, %s1101_s18 }
   0xc   : > { %s1400_s25 = smov (%p35_p0, %s33_s25), 0  ;;  %p82_p5 = scmp.eq.s32.totalorder %s1191_s24, 0 }
   0xd   : > { %1384 = sst [smem:[#allocation11_spill]] %s1400_s25  ;;  %p1200_p3 = por %p76_p2, %p75_p1 }
   0xe   : > { %s65_s28 = ssub.s32 %s1117_s22, %s1400_s25  ;;  %p185_p7 = scmp.eq.s32.totalorder %s1191_s24, 1 }
   0xf   : > { %p66_p6 = scmp.eq.s32.totalorder %s65_s28, 0  ;;  %p1209_p8 = por %p82_p5, %p81_p4 }
  0x10   : > { %p1216_p9 = por %p185_p7, %p75_p1  ;;  %p926_p10 = scmp.lt.s32.totalorder %s1121_s23, 2 }
  0x11   : > { %s1214_s30 = scalar_select %p66_p6, %s1109_s20, %s68_s26  }
  0x12   : > { %s1222_s7 = sand.u32 1, %s1109_s20   ;;  %s890_s8 = sshll.u32 %s1117_s22, 10 }
  0x13   : > { %1387 = sst [smem:[#allocation12_spill]] %s1214_s30  ;;  %s853_s9 = sshll.u32 %s1222_s7, 6 }
  0x14   : > { %p1228_p11 = pnand %p926_p10, %p1200_p3  ;;  %s242_s11 = sand.u32 1, %s1121_s23  }
  0x15   : > { %s1390_s2 = sld [smem:[#allocation13_spill]]  ;;  %s246_s15 = scalar_lea.vmem [#allocation4], %s853_s9 }
  0x16   : > { %s253_s16 = sshll.u32 %s246_s15, 4  ;;  %p862_p12 = scmp.ge.s32.totalorder %s1121_s23, 1  ;;  %s254_s16 = int_to_ptr.vmem [resolvable:$true] %s253_s16 }
  0x17   : > { %s1241_s17 = scalar_lea.sflag [#allocation5], %s242_s11  ;;  %p985_p13 = pneg %p1228_p11 }
  0x18   : > { %s996_s18 = scalar_lea.vmem %s254_s16, 1024  ;;  %s1123_s26 = smov [#allocation4]  }
  0x19   : > { %p997_p0 = scmp.ne.s32.totalorder %s254_s16, %s996_s18  ;;  %s1001_s27 = sshll.u32 %s1123_s26, 4  ;;  %s1002_s27 = int_to_ptr.vmem [resolvable:$false] %s1001_s27 }
  0x1a   : > { %s1003_s28 = scalar_lea.vmem %s1002_s27, 2048  ;;  %p1004_p3 = scmp.lt.s32.totalorder %s254_s16, %s1002_s27 }
  0x1b   : > { %s252_s14 = scalar_lea.hbm %s1390_s2, %s890_s8  ;;  %p999_p1 = pnand %p997_p0, %p985_p13 }
  0x1c   : > { %p1005_p4 = scmp.lt.s32.totalorder %s1003_s28, %s996_s18 }
  0x1d   : > { %p1000_p2 = pneg %p999_p1 }
  0x1e   : > { %p1006_p5 = por %p1005_p4, %p1004_p3 }
  0x20   : > { %p1007_p6 = pnand %p1006_p5, %p1000_p2 }
  0x22   : > { %1010 = shalt.err (!%p1007_p6)
}
  0x23   : > { %s1124_s12 = smov 128   ;;  %s1125_s11 = smov 8  }
  0x24   : > { %922 = dma.hbm_to_vmem [thread:$0]  (!%p1228_p11), %s252_s14, 1024, %s254_s16, %s1241_s17, %s1124_s12, %s1124_s12, %s1125_s11  }
  0x25   : > { %p289_p7 = scmp.lt.s32.totalorder %s1121_s23, 3  ;;  %s231_s26 = scalar_lea.hbm %s1375_s1, %s890_s8 }
  0x26   : > { %s225_s27 = scalar_lea.vmem [#allocation2], %s853_s9  ;;  %s859_s2 = sshll.u32 %s1222_s7, 7 }
  0x27   : > { %p1254_p10 = pnand %p862_p12, %p289_p7  ;;  %s232_s28 = sshll.u32 %s225_s27, 4  ;;  %s233_s28 = int_to_ptr.vmem [resolvable:$true] %s232_s28 }
  0x28   : > { %s222_s25 = scalar_lea.sflag [#allocation3], %s1222_s7  ;;  %s1024_s30 = scalar_lea.vmem %s233_s28, 1024 }
  0x29   : > { %p1025_p0 = scmp.ne.s32.totalorder %s233_s28, %s1024_s30  ;;  %s1126_s14 = smov [#allocation2]  }
  0x2a   : > { %s1029_s16 = sshll.u32 %s1126_s14, 4  ;;  %s1030_s16 = int_to_ptr.vmem [resolvable:$false] %s1029_s16 }
  0x2b   : > { %p1027_p1 = pnand %p1025_p0, %p985_p13  ;;  %s1031_s20 = scalar_lea.vmem %s1030_s16, 2048 }
  0x2c   : > { %p1032_p2 = scmp.lt.s32.totalorder %s233_s28, %s1030_s16  ;;  %p1033_p3 = scmp.lt.s32.totalorder %s1031_s20, %s1024_s30 }
  0x2d   : > { %p1028_p12 = pneg %p1027_p1 }
  0x2e   : > { %p1034_p4 = por %p1033_p3, %p1032_p2 }
  0x30   : > { %p1035_p5 = pnand %p1034_p4, %p1028_p12 }
  0x32   : > { %1038 = shalt.err (!%p1035_p5)
}
  0x33   : > { %919 = dma.hbm_to_vmem [thread:$0]  (!%p1228_p11), %s231_s26, 1024, %s233_s28, %s222_s25, %s1124_s12, %s1124_s12, %s1125_s11  }
  0x34   : > { %s892_s7 = sshll.u32 %s1117_s22, 11  ;;  %s267_s18 = scalar_lea.vmem [#allocation6], %s859_s2 }
  0x35   : > { %s273_s15 = scalar_lea.hbm %s1377_s3, %s892_s7  ;;  %s274_s27 = sshll.u32 %s267_s18, 4  ;;  %s275_s27 = int_to_ptr.vmem [resolvable:$true] %s274_s27 }
  0x36   : > { %s1052_s14 = scalar_lea.vmem %s275_s27, 2048  ;;  %s1127_s20 = smov [#allocation6]  }
  0x37   : > { %p1053_p6 = scmp.ne.s32.totalorder %s275_s27, %s1052_s14  ;;  %s1057_s30 = sshll.u32 %s1127_s20, 4  ;;  %s1058_s30 = int_to_ptr.vmem [resolvable:$false] %s1057_s30 }
  0x38   : > { %s1059_s16 = scalar_lea.vmem %s1058_s30, 4096  ;;  %p1060_p1 = scmp.lt.s32.totalorder %s275_s27, %s1058_s30 }
  0x39   : > { %p1055_p7 = pnand %p1053_p6, %p985_p13  ;;  %p1061_p12 = scmp.lt.s32.totalorder %s1059_s16, %s1052_s14 }
  0x3b   : > { %p1056_p0 = pneg %p1055_p7  ;;  %p1062_p2 = por %p1061_p12, %p1060_p1 }
  0x3d   : > { %p1063_p3 = pnand %p1062_p2, %p1056_p0 }
  0x3f   : > { %1066 = shalt.err (!%p1063_p3)
}
  0x40   : > { %s1128_s25 = smov 256   ;;  %s1129_s2 = smov 16  }
  0x41   : > { %925 = dma.hbm_to_vmem [thread:$0]  (!%p1228_p11), %s273_s15, 2048, %s275_s27, %s1241_s17, %s1128_s25, %s1128_s25, %s1129_s2  }
  0x42   : > { %293 = sbr.rel (%p1254_p10) target bundleno = 546 (0x222), region = 40  ;;  %s1285_s12 = sand.u32 (!%p1254_p10), 1, %s1105_s19  }
  0x43   : > { %s863_s11 = sshll.u32 (!%p1254_p10), %s1285_s12, 6  ;;  %s296_s26 = scalar_lea.sflag (!%p1254_p10), [#allocation3], %s1285_s12 }
  0x44   : > { %s1289_s28 = scalar_lea.vmem (!%p1254_p10), [#allocation2], %s863_s11 }
  0x47   : > { %1092 = dma.done.wait (%p1209_p8), %s296_s26, 1024  }
  0x48   : > { %1094 = vsyncadd (%p1209_p8), %s296_s26, 4294966272  ;;  %s304_s10 = sand.u32 1, %s1191_s24   ;;  %s1296_s13 = scalar_lea.vmem [#allocation4], %s863_s11 }
  0x49   : > { %s305_s17 = scalar_lea.sflag [#allocation5], %s304_s10 }
  0x4a   : > { %1096 = dma.done.wait (%p1209_p8), %s305_s17, 3072  }
  0x4b   : > { %1098 = vsyncadd (%p1209_p8), %s305_s17, 4294964224  ;;  %v1130_v0 = vmov 0   ;;  %v385_v1 = vld [vmem:[%s1296_s13] sm:$0xff]  ;;  %v870_v3 = vld [vmem:[%s1296_s13 + $0x8] sm:$0xff]  ;;  %s865_s24 = sshll.u32 %s1285_s12, 7  ;;  %v1131_v17 = vmov 0.0  }
  0x4c   : > { %982 = vset.pattern.permute.xlu1 %v1130_v0  ;;  %981 = vset.pattern.permute.xlu0 %v1130_v0  ;;  %v378_v2 = vld [vmem:[%s1289_s28] sm:$0xff]  ;;  %v869_v4 = vld [vmem:[%s1289_s28 + $0x8] sm:$0xff]  ;;  %v872_v5 = vld [vmem:[%s1296_s13 + $0x10] sm:$0xff]  ;;  %s1319_s29 = scalar_lea.vmem [#allocation6], %s865_s24  ;;  %p364_p8 = scmp.lt.s32.totalorder %s1113_s21, 1  ;;  %vm578_vm0 = vcmask 523264  }
  0x4d   : > { %388 = vperm.xlu1 %982, %v385_v1   ;;  %381 = vperm.xlu0 %981, %v378_v2   ;;  %v871_v6 = vld [vmem:[%s1289_s28 + $0x10] sm:$0xff]  ;;  %v874_v7 = vld [vmem:[%s1296_s13 + $0x18] sm:$0xff]  ;;  %v876_v9 = vld [vmem:[%s1296_s13 + $0x20] sm:$0xff]  ;;  %s866_s16 = sshll.u32 %s1285_s12, 5  ;;  %s893_s2 = sshll.u32 (%p1216_p9), %s1113_s21, 4 }
  0x4e   : > { %v873_v8 = vld [vmem:[%s1289_s28 + $0x18] sm:$0xff]  ;;  %v875_v10 = vld [vmem:[%s1289_s28 + $0x20] sm:$0xff]  ;;  %v878_v11 = vld [vmem:[%s1296_s13 + $0x28] sm:$0xff]  ;;  %649 = vmatprep.mubr.f32.mxu0 %v1131_v17  ;;  %655 = vmatprep.mubr.f32.mxu1 %v1131_v17  ;;  %s1339_s7 = scalar_select %p364_p8, %s1113_s21, 1 }
  0x4f   : > { %v877_v12 = vld [vmem:[%s1289_s28 + $0x28] sm:$0xff]  ;;  %v880_v13 = vld [vmem:[%s1296_s13 + $0x30] sm:$0xff]  ;;  %v882_v15 = vld [vmem:[%s1296_s13 + $0x38] sm:$0xff]  ;;  %s363_s25 = scalar_lea.vmem [#allocation7], %s866_s16  ;;  %s682_s26 = scalar_lea.vmem (%p1216_p9), %s1379_s5, %s893_s2 }
  0x50   : > { %v879_v14 = vld [vmem:[%s1289_s28 + $0x30] sm:$0xff]  ;;  %v881_v16 = vld [vmem:[%s1289_s28 + $0x38] sm:$0xff]  ;;  %v531_v20 = vld [vmem:[%s1319_s29 + $0x68] sm:$0xff]  ;;  %s867_s8 = sshll.u32 %s1339_s7, 3  ;;  %s868_s27 = sshll.u32 %s1339_s7, 1 }
  0x51   : > { %405 = vperm.xlu1 %982, %v870_v3   ;;  %397 = vperm.xlu0 %981, %v869_v4   ;;  %v533_v18 = vld [vmem:[%s1319_s29 + $0x78] sm:$0xff]  ;;  %v532_v19 = vld [vmem:[%s1319_s29 + $0x70] sm:$0xff]  ;;  %v530_v21 = vld [vmem:[%s1319_s29 + $0x60] sm:$0xff]  ;;  %s370_s18 = scalar_lea.vmem %s1374_s0, %s867_s8  ;;  %s374_s30 = scalar_lea.vmem %s1378_s4, %s868_s27 }
  0x52   : > { %601 = vmatprep.subr.mxu0 %v533_v18  ;;  %894 = vmatprep.subr.mxu1 %v533_v18  ;;  %v529_v22 = vld [vmem:[%s1319_s29 + $0x58] sm:$0xff]  ;;  %v528_v23 = vld [vmem:[%s1319_s29 + $0x50] sm:$0xff]  ;;  %v527_v24 = vld [vmem:[%s1319_s29 + $0x48] sm:$0xff] }
  0x53   : > { %602 = vmatpush1.msra.mxu0 %v532_v19  ;;  %902 = vmatpush1.msra.mxu1 %v532_v19  ;;  %v526_v25 = vld [vmem:[%s1319_s29 + $0x40] sm:$0xff]  ;;  %v525_v26 = vld [vmem:[%s1319_s29 + $0x38] sm:$0xff]  ;;  %v524_v27 = vld [vmem:[%s1319_s29 + $0x30] sm:$0xff]  ;;  %v536_v19 = vlaneseq }
  0x54   : > { %603 = vmatprep.subr.mxu0 %v531_v20  ;;  %895 = vmatprep.subr.mxu1 %v531_v20  ;;  %v523_v28 = vld [vmem:[%s1319_s29 + $0x28] sm:$0xff]  ;;  %v522_v29 = vld [vmem:[%s1319_s29 + $0x20] sm:$0xff]  ;;  %v521_v30 = vld [vmem:[%s1319_s29 + $0x18] sm:$0xff] }
  0x55   : > { %423 = vperm.xlu1 %982, %v872_v5   ;;  %415 = vperm.xlu0 %981, %v871_v6   ;;  %v520_v31 = vld [vmem:[%s1319_s29 + $0x10] sm:$0xff]  ;;  %v519_v32 = vld [vmem:[%s1319_s29 + $0x8] sm:$0xff]  ;;  %v518_v33 = vld [vmem:[%s1319_s29] sm:$0xff]  ;;  %v537_v20 = vshrl.u32 %v536_v19, 7 }
  0x56   : > { %604 = vmatpush1.msra.mxu0 %v530_v21  ;;  %903 = vmatpush1.msra.mxu1 %v530_v21  ;;  %v377_v34 = vld [vmem:[%s370_s18] sm:$0xff] }
  0x57   : > { %605 = vmatprep.subr.mxu0 %v529_v22  ;;  %896 = vmatprep.subr.mxu1 %v529_v22  ;;  %v538_v21 = vsub.s32 0, %v537_v20  ;;  %v534_v22 = vld [vmem:[%s374_s30] sm:$0x3] }
  0x58   : > { %606 = vmatpush1.msra.mxu0 %v528_v23  ;;  %904 = vmatpush1.msra.mxu1 %v528_v23  ;;  %v542_v23 = vsub.s32 1, %v537_v20 }
  0x59   : > { %441 = vperm.xlu1 %982, %v874_v7   ;;  %433 = vperm.xlu0 %981, %v873_v8  }
  0x5a   : > { %607 = vmatprep.subr.mxu0 %v527_v24  ;;  %897 = vmatprep.subr.mxu1 %v527_v24  ;;  %v539_v24 = vrot.slane %v534_v22, %v538_v21 }
  0x5b   : > { %608 = vmatpush1.msra.mxu0 %v526_v25  ;;  %905 = vmatpush1.msra.mxu1 %v526_v25  ;;  %v543_v25 = vrot.slane %v534_v22, %v542_v23 }
  0x5c   : > { %609 = vmatprep.subr.mxu0 %v525_v26  ;;  %898 = vmatprep.subr.mxu1 %v525_v26 }
  0x5d   : > { %459 = vperm.xlu1 %982, %v876_v9   ;;  %451 = vperm.xlu0 %981, %v875_v10  }
  0x5e   : > { %610 = vmatpush1.msra.mxu0 %v524_v27  ;;  %906 = vmatpush1.msra.mxu1 %v524_v27 }
  0x5f   : > { %611 = vmatprep.subr.mxu0 %v523_v28  ;;  %899 = vmatprep.subr.mxu1 %v523_v28 }
  0x60   : > { %612 = vmatpush1.msra.mxu0 %v522_v29  ;;  %907 = vmatpush1.msra.mxu1 %v522_v29 }
  0x61   : > { %477 = vperm.xlu1 %982, %v878_v11   ;;  %469 = vperm.xlu0 %981, %v877_v12  }
  0x62   : > { %613 = vmatprep.subr.mxu0 %v521_v30  ;;  %900 = vmatprep.subr.mxu1 %v521_v30 }
  0x63   : > { %614 = vmatpush1.msra.mxu0 %v520_v31  ;;  %908 = vmatpush1.msra.mxu1 %v520_v31 }
  0x64   : > { %615 = vmatprep.subr.mxu0 %v519_v32  ;;  %901 = vmatprep.subr.mxu1 %v519_v32 }
  0x65   : > { %495 = vperm.xlu1 %982, %v880_v13   ;;  %487 = vperm.xlu0 %981, %v879_v14  }
  0x66   : > { %616 = vmatpush1.msra.mxu0 %v518_v33  ;;  %909 = vmatpush1.msra.mxu1 %v518_v33 }
  0x69   : > { %513 = vperm.xlu1 %982, %v882_v15   ;;  %505 = vperm.xlu0 %981, %v881_v16  }
  0xc8   : > { %v389_v35 = vpop.permute.xlu1 %388  ;;  %v382_v36 = vpop.permute.xlu0 %381 }
  0xc9   : > { %v384_v37 = vsub.f32 %v377_v34, %v382_v36 }
  0xcb   : > { %v391_v38 = vmul.f32 %v389_v35, %v384_v37 }
  0xcc   : > { %v406_v39 = vpop.permute.xlu1 %405  ;;  %v398_v40 = vpop.permute.xlu0 %397 }
  0xcd   : > { %v392_v41 = vmin.f32 %v391_v38, 1.0  ;;  %v400_v42 = vsub.f32 %v377_v34, %v398_v40 }
  0xcf   : > { %v408_v43 = vmul.f32 %v406_v39, %v400_v42  ;;  %546 = vxpose.xlu0.b32.start [1/8] (short) (narrow) %v392_v41, 16 }
  0xd0   : > { %v424_v44 = vpop.permute.xlu1 %423  ;;  %v416_v45 = vpop.permute.xlu0 %415 }
  0xd1   : > { %v409_v46 = vmin.f32 %v408_v43, 1.0  ;;  %v418_v47 = vsub.f32 %v377_v34, %v416_v45 }
  0xd3   : > { %v410_v48 = vmax.f32 %v409_v46, 0.0  ;;  %v426_v49 = vmul.f32 %v424_v44, %v418_v47 }
  0xd4   : > { %v442_v50 = vpop.permute.xlu1 %441  ;;  %v434_v51 = vpop.permute.xlu0 %433 }
  0xd5   : > { %v427_v52 = vmin.f32 %v426_v49, 1.0  ;;  %v436_v53 = vsub.f32 %v377_v34, %v434_v51  ;;  %547 = vxpose.xlu0.b32.cont [2/8] (short) (narrow) %v410_v48, 16 }
  0xd7   : > { %v428_v54 = vmax.f32 %v427_v52, 0.0  ;;  %v444_v55 = vmul.f32 %v442_v50, %v436_v53 }
  0xd8   : > { %v460_v56 = vpop.permute.xlu1 %459  ;;  %v452_v57 = vpop.permute.xlu0 %451 }
  0xd9   : > { %v445_v58 = vmin.f32 %v444_v55, 1.0  ;;  %v454_v59 = vsub.f32 %v377_v34, %v452_v57  ;;  %548 = vxpose.xlu0.b32.cont [3/8] (short) (narrow) %v428_v54, 16 }
  0xdb   : > { %v446_v60 = vmax.f32 %v445_v58, 0.0  ;;  %v462_v61 = vmul.f32 %v460_v56, %v454_v59 }
  0xdc   : > { %v478_v62 = vpop.permute.xlu1 %477  ;;  %v470_v63 = vpop.permute.xlu0 %469 }
  0xdd   : > { %v463_v0 = vmin.f32 %v462_v61, 1.0  ;;  %v472_v1 = vsub.f32 %v377_v34, %v470_v63  ;;  %549 = vxpose.xlu0.b32.cont [4/8] (short) (narrow) %v446_v60, 16 }
  0xdf   : > { %v464_v2 = vmax.f32 %v463_v0, 0.0  ;;  %v480_v3 = vmul.f32 %v478_v62, %v472_v1 }
  0xe0   : > { %v496_v4 = vpop.permute.xlu1 %495  ;;  %v488_v5 = vpop.permute.xlu0 %487 }
  0xe1   : > { %v481_v6 = vmin.f32 %v480_v3, 1.0  ;;  %v490_v7 = vsub.f32 %v377_v34, %v488_v5  ;;  %550 = vxpose.xlu0.b32.cont [5/8] (short) (narrow) %v464_v2, 16 }
  0xe3   : > { %v482_v8 = vmax.f32 %v481_v6, 0.0  ;;  %v498_v9 = vmul.f32 %v496_v4, %v490_v7 }
  0xe4   : > { %v506_v10 = vpop.permute.xlu0 %505  ;;  %v514_v13 = vpop.permute.xlu1 %513 }
  0xe5   : > { %v499_v11 = vmin.f32 %v498_v9, 1.0  ;;  %v508_v12 = vsub.f32 %v377_v34, %v506_v10  ;;  %551 = vxpose.xlu0.b32.cont [6/8] (short) (narrow) %v482_v8, 16 }
  0xe7   : > { %v500_v14 = vmax.f32 %v499_v11, 0.0  ;;  %v516_v15 = vmul.f32 %v514_v13, %v508_v12 }
  0xe9   : > { %552 = vxpose.xlu0.b32.cont [7/8] (short) (narrow) %v500_v14, 16  ;;  %v517_v16 = vmax.f32 %v516_v15, 0.0 }
  0xed   : > { %553 = vxpose.xlu0.b32.end [8/8] (short) (narrow) %v517_v16, 16 }
 0x14d   : > { %v562_v17 = vpop.trf.xlu0 }
 0x14e   : > { %883 = vmatmul.mubr.msk.f32.vlgmr.msra.gmra.mxu0 %vm578_vm0, %v562_v17 }
 0x151   : > { %v563_v18 = vpop.trf.xlu0 }
 0x152   : > { %884 = vmatmul.mubr.msk.f32.vlgmr.msra.gmra.mxu1 %vm578_vm0, %v563_v18 }
 0x20e   : > { %v651_v26 = vpop.f32.mrf.mxu0 }
 0x20f   : > { %v652_v27 = vadd.f32 %v651_v26, %v539_v24 }
 0x210   : > { %v653_v28 = vpop.f32.mrf.mxu0 }
 0x211   : > { %v662_v29 = vmax.f32 %v652_v27, 0.0  ;;  %v654_v30 = vadd.f32 %v653_v28, %v543_v25 }
 0x212   : > { %v657_v31 = vpop.f32.mrf.mxu1 }
 0x213   : > { %666 = vst [vmem:[%s363_s25] sm:$0xff] %v662_v29  ;;  %v663_v32 = vmax.f32 %v654_v30, 0.0  ;;  %v658_v33 = vadd.f32 %v657_v31, %v539_v24 }
 0x214   : > { %v659_v34 = vpop.f32.mrf.mxu1 }
 0x215   : > { %667 = vst [vmem:[%s363_s25 + $0x8] sm:$0xff] %v663_v32  ;;  %v664_v35 = vmax.f32 %v658_v33, 0.0  ;;  %v660_v36 = vadd.f32 %v659_v34, %v543_v25  ;;  %676 = sbr.rel (!%p1216_p9) target bundleno = 546 (0x222), region = 56 }
 0x217   : > { %668 = vst [vmem:[%s363_s25 + $0x10] sm:$0xff] %v664_v35  ;;  %v665_v37 = vmax.f32 %v660_v36, 0.0 }
 0x219   : > { %669 = vst [vmem:[%s363_s25 + $0x18] sm:$0xff] %v665_v37 }
 0x21a   : > { %v695_v38 = vld [vmem:[%s363_s25] sm:$0xff] }
 0x21b   : > { %696 = vst [vmem:[%s682_s26] sm:$0xff] %v695_v38 }
 0x21c   : > { %v697_v39 = vld [vmem:[%s363_s25 + $0x8] sm:$0xff] }
 0x21d   : > { %698 = vst [vmem:[%s682_s26 + $0x8] sm:$0xff] %v697_v39 }
 0x21e   : > { %v699_v40 = vld [vmem:[%s363_s25 + $0x10] sm:$0xff] }
 0x21f   : > { %700 = vst [vmem:[%s682_s26 + $0x20] sm:$0xff] %v699_v40 }
 0x220   : > { %v701_v41 = vld [vmem:[%s363_s25 + $0x18] sm:$0xff] }
 0x221   : > { %702 = vst [vmem:[%s682_s26 + $0x28] sm:$0xff] %v701_v41 }
 0x222 PF: > { %s21_s23 = sadd.s32 1, %s1121_s23   ;;  %s1392_s6 = sld [smem:[#allocation10_spill]] }
 0x223   : > { %p18_p11 = scmp.ge.s32.totalorder %s21_s23, 4   ;;  %s1393_s20 = sld [smem:[#allocation12_spill]] }
 0x224   : > { %s1394_s28 = sld [smem:[#allocation11_spill]]  ;;  %s1395_s18 = smov %s1105_s19 }
 0x225   : > { %s1397_s21 = smov %s1117_s22 }
 0x226   :  { %20 = sbr.rel (!%p18_p11) target bundleno = 8 (0x8), region = 147 }
 0x228   : > { %s1396_s19 = smov %s1392_s6 }
 0x22a   : > { %s1398_s22 = smov %s1394_s28 }
 0x22b   :  { %718 = vsyncpa [#allocation3], 1 }
 0x22c   :  { %720 = vsyncpa [#allocation3 + $0x1], 1 }
 0x22d   :  { %721 = vsyncpa [#allocation5], 1 }
 0x22e   :  { %723 = vsyncpa [#allocation5 + $0x1], 1 }

</bundles_post_ra>
